<compile_context>
chip_gen: v5e
topology: v5e:2x2
jax: 0.10.0
libtpu: 0.0.40
codegen_flags: <defaults>
</compile_context>

<pallas_src>
import functools

import jax
import jax.numpy as jnp
from jax import lax
from jax.experimental import pallas as pl
from jax.experimental.pallas import tpu as pltpu


def _round_up(n, m):
    return ((n + m - 1) // m) * m


# ------------------------------ kernels ------------------------------------ #

def _norm_classifier_kernel(x_ref, w_ref, o_ref, *, inv_temp):
    # x_ref: (TB, D), w_ref: (C_pad, D), o_ref: (TB, C_pad)
    x = x_ref[...]
    xf = x.astype(jnp.float32)

    # F.normalize(p=2, dim=1, eps=1e-12): x / max(||x||, eps)
    # => per-row scale = rsqrt(max(sum(x^2), eps^2)); fold in 1/temp.
    sq = jnp.sum(xf * xf, axis=-1, keepdims=True)            # (TB, 1) f32
    scale = lax.rsqrt(jnp.maximum(sq, 1e-24)) * inv_temp     # EUP rsqrt

    w = w_ref[...]
    xm = x if x.dtype == w.dtype else x.astype(w.dtype)      # only if mxu_dtype set
    # (TB, D) x (C_pad, D) contracting on D -> (TB, C_pad); no W transpose.
    logits = lax.dot_general(
        xm, w,
        dimension_numbers=(((1,), (1,)), ((), ())),
        preferred_element_type=jnp.float32)
    # Apply the row scale on the small (TB, C_pad) f32 accumulator, not on (TB, D).
    o_ref[...] = (logits * scale).astype(o_ref.dtype)


def _plain_classifier_kernel(x_ref, w_ref, o_ref):
    x = x_ref[...]
    w = w_ref[...]
    xm = x if x.dtype == w.dtype else x.astype(w.dtype)
    logits = lax.dot_general(
        xm, w,
        dimension_numbers=(((1,), (1,)), ((), ())),
        preferred_element_type=jnp.float32)
    o_ref[...] = logits.astype(o_ref.dtype)


# ------------------------------ wrapper ------------------------------------ #

def _jnp_forward(x, w, temp, norm):
    # Tiny-shape fallback: fused XLA path (kernel launch overhead dominates).
    if norm:
        xf = x.astype(jnp.float32)
        sq = jnp.sum(xf * xf, axis=-1, keepdims=True)
        scale = lax.rsqrt(jnp.maximum(sq, 1e-24)) * (1.0 / temp)
        out = jnp.dot(x, w.T, preferred_element_type=jnp.float32) * scale
        return out.astype(x.dtype)
    return jnp.dot(x, w.T, preferred_element_type=jnp.float32).astype(x.dtype)


def res_classifier_mme_forward(x, w, *, temp=0.05, norm=True, return_feat=False,
                               use_pallas=None, mxu_dtype=None):
    """Pallas implementation of ResClassifier_MME.forward.

    x: (B, D) activations; w: (C, D) nn.Linear weight (bias=False).
    mxu_dtype: optional MXU operand dtype (e.g. jnp.bfloat16 on v6e/v7x);
               numerics-visible, default off.
    """
    if return_feat:
        return x

    B, D = x.shape
    C, D2 = w.shape
    assert D == D2

    if use_pallas is None:
        # Below a few MFLOP the pad/launch/slice overhead dominates.
        use_pallas = (2 * B * D * max(C, 1)) >= 2_000_000
    if not use_pallas:
        return _jnp_forward(x, w, temp, norm)

    # Pad class dim to a lane-dense multiple of 128 (unmasked vst, full MXU lanes).
    # Do NOT pad further: the kernel is HBM-bound at small C on all generations.
    C_pad = _round_up(max(C, 1), 128)
    # TODO(synk): for very large input_size where the resident (C_pad, D) W tile
    # alone exceeds VMEM, add a K grid axis over D with an f32 accumulator (P3).
    w_p = w if C_pad == C else jnp.pad(w, ((0, C_pad - C), (0, 0)))
    if mxu_dtype is not None:
        w_p = w_p.astype(mxu_dtype)

    bx = x.dtype.itemsize
    bw = w_p.dtype.itemsize
    bo = x.dtype.itemsize

    # Per-generation VMEM budget (v7x: 64 MiB per core; v5e/v6e: 128 MiB).
    phys_vmem = 64 << 20  # conservative default
    try:
        phys_vmem = int(pltpu.get_tpu_info().vmem_capacity_bytes)
    except Exception:
        pass

    w_bytes = C_pad * D * bw                      # resident, single-buffered W
    tile_budget = max(8 << 20, min(phys_vmem // 3, 40 << 20))
    avail = max(tile_budget - w_bytes, 2 << 20)
    # Per-batch-row footprint: 2 pipelined x buffers + 2 pipelined out buffers
    # + in-kernel f32 temporaries (x^2 reduce and f32 logits).
    per_row = 2 * D * bx + 2 * C_pad * bo + 4 * D + 4 * C_pad
    TB = max(8, min(512, (int(avail // per_row) // 8) * 8))
    if B >= 16:
        # Keep >=2 grid steps: megacore sharding on v7x + DMA/compute overlap.
        TB = min(TB, _round_up(pl.cdiv(B, 2), 8))
    if B <= TB:
        TB = B                                    # full-extent block, always legal
    num_blocks = pl.cdiv(B, TB)

    vmem_limit = int(min(max(w_bytes + TB * per_row + (4 << 20), 16 << 20),
                         phys_vmem - (8 << 20)))

    if norm:
        kernel = functools.partial(_norm_classifier_kernel,
                                   inv_temp=float(1.0 / temp))
    else:
        # NOTE: no /temp here on purpose -- matches the PyTorch forward for norm=False.
        kernel = _plain_classifier_kernel

    def _run(single_buffer_w):
        w_kwargs = dict(pipeline_mode=pl.Buffered(1)) if single_buffer_w else {}
        return pl.pallas_call(
            kernel,
            out_shape=jax.ShapeDtypeStruct((B, C_pad), x.dtype),
            grid=(num_blocks,),
            in_specs=[
                pl.BlockSpec((TB, D), lambda i: (i, 0)),                       # x tiles
                pl.BlockSpec((C_pad, D), lambda i: (0, 0), **w_kwargs),        # W resident
            ],
            out_specs=pl.BlockSpec((TB, C_pad), lambda i: (i, 0)),
            compiler_params=pltpu.CompilerParams(
                dimension_semantics=("parallel",),
                vmem_limit_bytes=vmem_limit),
        )(x, w_p)

    try:
        out = _run(True)
    except Exception:
        # pl.Buffered(1) support can vary across jax versions; fall back to the
        # default double-buffered W spec (identical semantics, more VMEM).
        out = _run(False)

    return out if C_pad == C else out[:, :C]


def reference_forward(x, w, temp=0.05, norm=True):
    if norm:
        n = jnp.maximum(jnp.linalg.norm(x, axis=1, keepdims=True), 1e-12)
        return (x / n) @ w.T / temp
    return x @ w.T


if __name__ == "__main__":
    # Small shapes consistent with the module: batch=8, input_size=256,
    # num_classes=12, temp=0.05.
    B, D, C = 8, 256, 12
    temp = 0.05

    key = jax.random.PRNGKey(0)
    kx, kw = jax.random.split(key)
    x = jax.random.normal(kx, (B, D), dtype=jnp.float32)
    # weights_init(): normal(0.0, 0.1)
    w = 0.1 * jax.random.normal(kw, (C, D), dtype=jnp.float32)

    # Force the Pallas path so the kernel itself is exercised at demo shapes.
    out = res_classifier_mme_forward(x, w, temp=temp, norm=True, use_pallas=True)
    out = jax.block_until_ready(out)
    ref = reference_forward(x, w, temp=temp, norm=True)
    assert out.shape == (B, C)
    assert jnp.allclose(out, ref, atol=1e-3, rtol=1e-4), (
        f"norm=True max abs err {jnp.max(jnp.abs(out - ref))}")

    out2 = res_classifier_mme_forward(x, w, temp=temp, norm=False, use_pallas=True)
    out2 = jax.block_until_ready(out2)
    ref2 = reference_forward(x, w, temp=temp, norm=False)
    assert jnp.allclose(out2, ref2, atol=1e-3, rtol=1e-4), (
        f"norm=False max abs err {jnp.max(jnp.abs(out2 - ref2))}")

    # Auto path (tiny shapes -> fused XLA fallback) must agree too.
    out3 = jax.block_until_ready(
        res_classifier_mme_forward(x, w, temp=temp, norm=True))
    assert jnp.allclose(out3, ref, atol=1e-3, rtol=1e-4)

    print("KERNEL_OK")
</pallas_src>

<mosaic_0001>
module attributes {stable_mosaic.version = 11 : i64} {
  func.func @_norm_classifier_kernel(%arg0: i32, %arg1: memref<8x256xf32, #tpu.memory_space<vmem>>, %arg2: memref<128x256xf32, #tpu.memory_space<vmem>>, %arg3: memref<8x128xf32, #tpu.memory_space<vmem>>) attributes {dimension_semantics = [#tpu.dimension_semantics<parallel>], iteration_bounds = array<i64: 1>, scalar_prefetch = 0 : i64, scratch_operands = 0 : i64, tpu.core_type = #tpu.core_type<tc>, window_params = [{transform_indices = @transform_0, window_bounds = array<i64: 8, 256>}, {pipeline_mode = #tpu.pipeline_mode<synchronous>, transform_indices = @transform_1, window_bounds = array<i64: 128, 256>}, {transform_indices = @transform_2, window_bounds = array<i64: 8, 128>}]} {
    %c0 = arith.constant 0 : index
    %c0_0 = arith.constant 0 : index
    %0 = vector.load %arg1[%c0, %c0_0] : memref<8x256xf32, #tpu.memory_space<vmem>>, vector<8x256xf32>
    %1 = arith.mulf %0, %0 : vector<8x256xf32>
    %cst = arith.constant dense<0.000000e+00> : vector<8xf32>
    %2 = vector.multi_reduction <add>, %1, %cst [1] : vector<8x256xf32> to vector<8xf32>
    %3 = vector.shape_cast %2 : vector<8xf32> to vector<8x1xf32>
    %cst_1 = arith.constant 1.000000e-24 : f32
    %4 = vector.broadcast %cst_1 : f32 to vector<8x1xf32>
    %5 = arith.maximumf %3, %4 : vector<8x1xf32>
    %6 = math.rsqrt %5 : vector<8x1xf32>
    %cst_2 = arith.constant 2.000000e+01 : f32
    %7 = vector.broadcast %cst_2 : f32 to vector<8x1xf32>
    %8 = arith.mulf %6, %7 : vector<8x1xf32>
    %c0_3 = arith.constant 0 : index
    %c0_4 = arith.constant 0 : index
    %9 = vector.load %arg2[%c0_3, %c0_4] : memref<128x256xf32, #tpu.memory_space<vmem>>, vector<128x256xf32>
    %cst_5 = arith.constant dense<0.000000e+00> : vector<8x128xf32>
    %10 = tpu.matmul %0, %9, %cst_5 {dimension_numbers = #tpu.dot_dimension_numbers<[1], [1], [0], [0], [0, 0, 1, 0], [], []>} : vector<8x256xf32>, vector<128x256xf32>, vector<8x128xf32> -> vector<8x128xf32>
    %11 = vector.broadcast %8 : vector<8x1xf32> to vector<8x128xf32>
    %12 = arith.mulf %10, %11 : vector<8x128xf32>
    %c0_6 = arith.constant 0 : index
    %c0_7 = arith.constant 0 : index
    %13 = vector.load %arg3[%c0_6, %c0_7] : memref<8x128xf32, #tpu.memory_space<vmem>>, vector<8x128xf32>
    tpu.vector_store %arg3[%c0_6, %c0_7], %12 {strides = array<i32>} : memref<8x128xf32, #tpu.memory_space<vmem>>, vector<8x128xf32>,
    return
  }
  func.func @transform_0(%arg0: i32) -> (i32, i32) {
    %c0_i32 = arith.constant 0 : i32
    %c0_i32_0 = arith.constant 0 : i32
    return %arg0, %c0_i32 : i32, i32
  }
  func.func @transform_1(%arg0: i32) -> (i32, i32) {
    %c0_i32 = arith.constant 0 : i32
    %c0_i32_0 = arith.constant 0 : i32
    %c0_i32_1 = arith.constant 0 : i32
    return %c0_i32, %c0_i32_0 : i32, i32
  }
  func.func @transform_2(%arg0: i32) -> (i32, i32) {
    %c0_i32 = arith.constant 0 : i32
    %c0_i32_0 = arith.constant 0 : i32
    return %arg0, %c0_i32 : i32, i32
  }
}

module attributes {stable_mosaic.version = 11 : i64} {
  func.func @_norm_classifier_kernel(%arg0: i32, %arg1: memref<8x256xf32, #tpu.memory_space<vmem>>, %arg2: memref<128x256xf32, #tpu.memory_space<vmem>>, %arg3: memref<8x128xf32, #tpu.memory_space<vmem>>) attributes {dimension_semantics = [#tpu.dimension_semantics<parallel>], iteration_bounds = array<i64: 1>, scalar_prefetch = 0 : i64, scratch_operands = 0 : i64, tpu.core_type = #tpu.core_type<tc>, window_params = [{transform_indices = @transform_0, window_bounds = array<i64: 8, 256>}, {pipeline_mode = #tpu.pipeline_mode<synchronous>, transform_indices = @transform_1, window_bounds = array<i64: 128, 256>}, {transform_indices = @transform_2, window_bounds = array<i64: 8, 128>}]} {
    %c0 = arith.constant 0 : index
    %c0_0 = arith.constant 0 : index
    %0 = vector.load %arg1[%c0, %c0_0] : memref<8x256xf32, #tpu.memory_space<vmem>>, vector<8x256xf32>
    %1 = arith.mulf %0, %0 : vector<8x256xf32>
    %cst = arith.constant dense<0.000000e+00> : vector<8xf32>
    %2 = vector.multi_reduction <add>, %1, %cst [1] : vector<8x256xf32> to vector<8xf32>
    %3 = vector.shape_cast %2 : vector<8xf32> to vector<8x1xf32>
    %cst_1 = arith.constant 1.000000e-24 : f32
    %4 = vector.broadcast %cst_1 : f32 to vector<8x1xf32>
    %5 = arith.maximumf %3, %4 : vector<8x1xf32>
    %6 = math.rsqrt %5 : vector<8x1xf32>
    %cst_2 = arith.constant 2.000000e+01 : f32
    %7 = vector.broadcast %cst_2 : f32 to vector<8x1xf32>
    %8 = arith.mulf %6, %7 : vector<8x1xf32>
    %c0_3 = arith.constant 0 : index
    %c0_4 = arith.constant 0 : index
    %9 = vector.load %arg2[%c0_3, %c0_4] : memref<128x256xf32, #tpu.memory_space<vmem>>, vector<128x256xf32>
    %cst_5 = arith.constant dense<0.000000e+00> : vector<8x128xf32>
    %10 = tpu.matmul %0, %9, %cst_5 {dimension_numbers = #tpu.dot_dimension_numbers<[1], [1], [0], [0], [0, 0, 1, 0], [], []>} : vector<8x256xf32>, vector<128x256xf32>, vector<8x128xf32> -> vector<8x128xf32>
    %11 = vector.broadcast %8 : vector<8x1xf32> to vector<8x128xf32>
    %12 = arith.mulf %10, %11 : vector<8x128xf32>
    %c0_6 = arith.constant 0 : index
    %c0_7 = arith.constant 0 : index
    %13 = vector.load %arg3[%c0_6, %c0_7] : memref<8x128xf32, #tpu.memory_space<vmem>>, vector<8x128xf32>
    tpu.vector_store %arg3[%c0_6, %c0_7], %12 {strides = array<i32>} : memref<8x128xf32, #tpu.memory_space<vmem>>, vector<8x128xf32>,
    return
  }
  func.func @transform_0(%arg0: i32) -> (i32, i32) {
    %c0_i32 = arith.constant 0 : i32
    %c0_i32_0 = arith.constant 0 : i32
    return %arg0, %c0_i32 : i32, i32
  }
  func.func @transform_1(%arg0: i32) -> (i32, i32) {
    %c0_i32 = arith.constant 0 : i32
    %c0_i32_0 = arith.constant 0 : i32
    %c0_i32_1 = arith.constant 0 : i32
    return %c0_i32, %c0_i32_0 : i32, i32
  }
  func.func @transform_2(%arg0: i32) -> (i32, i32) {
    %c0_i32 = arith.constant 0 : i32
    %c0_i32_0 = arith.constant 0 : i32
    return %arg0, %c0_i32 : i32, i32
  }
}

</mosaic_0001>

<bundles_post_ra>
// kernel: tpu_custom_call.1
= control target key start
LH: loop header
LB: loop body
LE: loop exit
PB: predicated region body
PF: predicated region fallthrough
CT: control target
= control target key end

     0   :  { %7 = vsyncpa [#allocation3], 0  ;;  %s267_s0 = inlined_call_operand.hbm [shape: f32[8,256], index: 0, kind: input, shape index: {}]   ;;  %s268_s1 = inlined_call_operand.hbm [shape: f32[128,256], index: 1, kind: input, shape index: {}]   ;;  %s269_s2 = inlined_call_operand.hbm [shape: f32[8,128], index: 2, kind: output, shape index: {}]  }
   0x1   :  { %8 = vsyncpa [#allocation6], 0 }
   0x2   :  { %9 = vsyncpa [#allocation4], 0  ;;  %s15_s11 = sshll.u32 %s267_s0, 4  ;;  %s238_s12 = smov [#allocation2]   ;;  %s16_s11 = int_to_ptr.hbm [resolvable:$true] %s15_s11 }
   0x3   :  { %s17_s13 = sshll.u32 %s238_s12, 4  ;;  %s25_s16 = sshll.u32 %s268_s1, 4  ;;  %s18_s13 = int_to_ptr.vmem [resolvable:$true] %s17_s13  ;;  %s26_s16 = int_to_ptr.hbm [resolvable:$true] %s25_s16 }
   0x4   :  { %20 = dma.hbm_to_vmem [thread:$0]  %s16_s11, 256, %s18_s13, [#allocation3]  }
   0x5   :  { %s239_s17 = smov [#allocation5]   ;;  %s240_s19 = smov 256  }
   0x6   :  { %s27_s18 = sshll.u32 %s239_s17, 4  ;;  %s241_s20 = smov 16   ;;  %s28_s18 = int_to_ptr.vmem [resolvable:$true] %s27_s18 }
   0x7   :  { %33 = dma.hbm_to_vmem [thread:$0]  %s26_s16, 4096, %s28_s18, [#allocation6], %s240_s19, %s240_s19, %s241_s20  }
   0x8   :  { %232 = dma.done.wait [#allocation3], 256  }
   0x9   :  { %233 = vsyncadd [#allocation3], 4294967040 }
   0xa   :  { %234 = dma.done.wait [#allocation6], 4096  }
   0xb   :  { %235 = vsyncadd [#allocation6], 4294963200  ;;  %v91_v0 = vld [vmem:[#allocation5 + $0xf0] sm:$0xff]  ;;  %v92_v1 = vld [vmem:[#allocation5 + $0xf8] sm:$0xff]  ;;  %s242_s0 = smov [#allocation7]   ;;  %s142_s23 = sshll.u32 %s269_s2, 4  ;;  %s143_s23 = int_to_ptr.hbm [resolvable:$true] %s142_s23 }
   0xc   :  { %93 = vmatpush.xpose.msra.mxu0 %v91_v0  ;;  %113 = vmatpush.xpose.msra.mxu1 %v92_v1  ;;  %v89_v2 = vld [vmem:[#allocation5 + $0xe0] sm:$0xff]  ;;  %v90_v3 = vld [vmem:[#allocation5 + $0xe8] sm:$0xff]  ;;  %v87_v4 = vld [vmem:[#allocation5 + $0xd0] sm:$0xff]  ;;  %s140_s1 = sshll.u32 %s242_s0, 4  ;;  %s141_s1 = int_to_ptr.vmem [resolvable:$true] %s140_s1 }
   0xd   :  { %v88_v5 = vld [vmem:[#allocation5 + $0xd8] sm:$0xff]  ;;  %v42_v6 = vld [vmem:[#allocation2] sm:$0xff]  ;;  %v85_v10 = vld [vmem:[#allocation5 + $0xc0] sm:$0xff] }
   0xe   :  { %v43_v7 = vld [vmem:[#allocation2 + $0x8] sm:$0xff]  ;;  %v44_v8 = vmul.f32 %v42_v6, %v42_v6  ;;  %v86_v11 = vld [vmem:[#allocation5 + $0xc8] sm:$0xff]  ;;  %v83_v13 = vld [vmem:[#allocation5 + $0xb0] sm:$0xff] }
   0xf   :  { %v45_v9 = vmul.f32 %v43_v7, %v43_v7  ;;  %v84_v14 = vld [vmem:[#allocation5 + $0xb8] sm:$0xff]  ;;  %v81_v15 = vld [vmem:[#allocation5 + $0xa0] sm:$0xff]  ;;  %v82_v16 = vld [vmem:[#allocation5 + $0xa8] sm:$0xff] }
  0x10   :  { %94 = vmatpush.xpose.msra.mxu0 %v89_v2  ;;  %114 = vmatpush.xpose.msra.mxu1 %v90_v3  ;;  %v79_v17 = vld [vmem:[#allocation5 + $0x90] sm:$0xff]  ;;  %v80_v18 = vld [vmem:[#allocation5 + $0x98] sm:$0xff]  ;;  %v77_v19 = vld [vmem:[#allocation5 + $0x80] sm:$0xff] }
  0x11   :  { %v46_v12 = vadd.f32 %v45_v9, %v44_v8  ;;  %v78_v20 = vld [vmem:[#allocation5 + $0x88] sm:$0xff]  ;;  %v75_v21 = vld [vmem:[#allocation5 + $0x70] sm:$0xff]  ;;  %v76_v22 = vld [vmem:[#allocation5 + $0x78] sm:$0xff] }
  0x12   :  { %v73_v23 = vld [vmem:[#allocation5 + $0x60] sm:$0xff]  ;;  %v74_v24 = vld [vmem:[#allocation5 + $0x68] sm:$0xff]  ;;  %v71_v25 = vld [vmem:[#allocation5 + $0x50] sm:$0xff] }
  0x13   :  { %47 = vadd.xlane.f32.xlu0 %v46_v12  ;;  %v72_v26 = vld [vmem:[#allocation5 + $0x58] sm:$0xff]  ;;  %v69_v27 = vld [vmem:[#allocation5 + $0x40] sm:$0xff]  ;;  %v70_v28 = vld [vmem:[#allocation5 + $0x48] sm:$0xff] }
  0x14   :  { %95 = vmatpush.xpose.msra.mxu0 %v87_v4  ;;  %115 = vmatpush.xpose.msra.mxu1 %v88_v5  ;;  %v67_v29 = vld [vmem:[#allocation5 + $0x30] sm:$0xff]  ;;  %v68_v30 = vld [vmem:[#allocation5 + $0x38] sm:$0xff]  ;;  %v65_v31 = vld [vmem:[#allocation5 + $0x20] sm:$0xff] }
  0x15   :  { %v66_v32 = vld [vmem:[#allocation5 + $0x28] sm:$0xff]  ;;  %v63_v33 = vld [vmem:[#allocation5 + $0x10] sm:$0xff]  ;;  %v64_v34 = vld [vmem:[#allocation5 + $0x18] sm:$0xff] }
  0x16   :  { %v61_v35 = vld [vmem:[#allocation5] sm:$0xff]  ;;  %v62_v36 = vld [vmem:[#allocation5 + $0x8] sm:$0xff] }
  0x18   :  { %96 = vmatpush.xpose.msra.mxu0 %v85_v10  ;;  %116 = vmatpush.xpose.msra.mxu1 %v86_v11 }
  0x1c   :  { %97 = vmatpush.xpose.msra.mxu0 %v83_v13  ;;  %117 = vmatpush.xpose.msra.mxu1 %v84_v14 }
  0x20   :  { %98 = vmatpush.xpose.msra.mxu0 %v81_v15  ;;  %118 = vmatpush.xpose.msra.mxu1 %v82_v16 }
  0x24   :  { %99 = vmatpush.xpose.msra.mxu0 %v79_v17  ;;  %119 = vmatpush.xpose.msra.mxu1 %v80_v18 }
  0x28   :  { %100 = vmatpush.xpose.msra.mxu0 %v77_v19  ;;  %120 = vmatpush.xpose.msra.mxu1 %v78_v20 }
  0x2c   :  { %101 = vmatpush.xpose.msra.mxu0 %v75_v21  ;;  %121 = vmatpush.xpose.msra.mxu1 %v76_v22 }
  0x30   :  { %102 = vmatpush.xpose.msra.mxu0 %v73_v23  ;;  %122 = vmatpush.xpose.msra.mxu1 %v74_v24 }
  0x34   :  { %103 = vmatpush.xpose.msra.mxu0 %v71_v25  ;;  %123 = vmatpush.xpose.msra.mxu1 %v72_v26 }
  0x38   :  { %104 = vmatpush.xpose.msra.mxu0 %v69_v27  ;;  %124 = vmatpush.xpose.msra.mxu1 %v70_v28 }
  0x3c   :  { %105 = vmatpush.xpose.msra.mxu0 %v67_v29  ;;  %125 = vmatpush.xpose.msra.mxu1 %v68_v30 }
  0x40   :  { %106 = vmatpush.xpose.msra.mxu0 %v65_v31  ;;  %126 = vmatpush.xpose.msra.mxu1 %v66_v32 }
  0x44   :  { %107 = vmatpush.xpose.msra.mxu0 %v63_v33  ;;  %127 = vmatpush.xpose.msra.mxu1 %v64_v34 }
  0x48   :  { %108 = vmatpush.xpose.msra.mxu0 %v61_v35  ;;  %128 = vmatpush.xpose.msra.mxu1 %v62_v36 }
  0x4b   :  { %109 = vmatmul.f32.vlgmr.msra.gmra.mxu0 %v42_v6  ;;  %129 = vmatmul.f32.vlgmr.msra.gmra.mxu1 %v43_v7 }
  0x86   :  { %v48_v37 = vpop.xlane.xlu0 %47 }
  0x87   :  { %v49_v38 = vmax.f32 %v48_v37, 1e-24 }
  0x89   :  { %158 = vrsqrt.f32 %v49_v38  ;;  %vm56_vm0 = vweird.f32 %v49_v38 }
  0x8f   :  { %v159_v39 = vpop.eup %158 }
  0x90   :  { %v51_v40 = vmul.f32 %v159_v39, %v49_v38  ;;  %vm57_vm1 = vweird.f32 %v159_v39 }
  0x91   :  { %vm58_vm2 = vmor %vm56_vm0, %vm57_vm1 }
  0x92   :  { %v52_v41 = vmul.f32 %v159_v39, %v51_v40 }
  0x94   :  { %v53_v42 = vmul.f32 0.5, %v52_v41 }
  0x96   :  { %v54_v43 = vsub.f32 1.5, %v53_v42 }
  0x98   :  { %v55_v44 = vmul.f32 %v159_v39, %v54_v43 }
  0x9a   :  { %v59_v45 = vsel %vm58_vm2, %v159_v39, %v55_v44 }
  0x9b   :  { %v60_v48 = vmul.f32 20.0, %v59_v45 }
  0xc8   :  { %v110_v46 = vpop.f32.mrf.mxu0  ;;  %v130_v47 = vpop.f32.mrf.mxu1 }
  0xc9   :  { %v131_v49 = vadd.f32 %v130_v47, %v110_v46 }
  0xcb   :  { %v133_v50 = vmul.f32 %v131_v49, %v60_v48 }
  0xcd   :  { %134 = vst [vmem:[#allocation7] sm:$0xff] %v133_v50 }
  0xce   :  { %145 = dma.vmem_to_hbm [thread:$0]  %s141_s1, 128, %s143_s23, [#allocation4]  }
  0xcf   :  { %236 = dma.done.wait [#allocation4], 128  }
  0xd0   :  { %237 = vsyncadd [#allocation4], 4294967168 }
  0xd1   :  { %150 = vsyncpa [#allocation3], 1 }
  0xd2   :  { %151 = vsyncpa [#allocation6], 1 }
  0xd3   :  { %152 = vsyncpa [#allocation4], 1 }

// kernel: tpu_custom_call.1
= control target key start
LH: loop header
LB: loop body
LE: loop exit
PB: predicated region body
PF: predicated region fallthrough
CT: control target
= control target key end

     0   :  { %7 = vsyncpa [#allocation3], 0  ;;  %s267_s0 = inlined_call_operand.hbm [shape: f32[8,256], index: 0, kind: input, shape index: {}]   ;;  %s268_s1 = inlined_call_operand.hbm [shape: f32[128,256], index: 1, kind: input, shape index: {}]   ;;  %s269_s2 = inlined_call_operand.hbm [shape: f32[8,128], index: 2, kind: output, shape index: {}]  }
   0x1   :  { %8 = vsyncpa [#allocation6], 0 }
   0x2   :  { %9 = vsyncpa [#allocation4], 0  ;;  %s15_s11 = sshll.u32 %s267_s0, 4  ;;  %s238_s12 = smov [#allocation2]   ;;  %s16_s11 = int_to_ptr.hbm [resolvable:$true] %s15_s11 }
   0x3   :  { %s17_s13 = sshll.u32 %s238_s12, 4  ;;  %s25_s16 = sshll.u32 %s268_s1, 4  ;;  %s18_s13 = int_to_ptr.vmem [resolvable:$true] %s17_s13  ;;  %s26_s16 = int_to_ptr.hbm [resolvable:$true] %s25_s16 }
   0x4   :  { %20 = dma.hbm_to_vmem [thread:$0]  %s16_s11, 256, %s18_s13, [#allocation3]  }
   0x5   :  { %s239_s17 = smov [#allocation5]   ;;  %s240_s19 = smov 256  }
   0x6   :  { %s27_s18 = sshll.u32 %s239_s17, 4  ;;  %s241_s20 = smov 16   ;;  %s28_s18 = int_to_ptr.vmem [resolvable:$true] %s27_s18 }
   0x7   :  { %33 = dma.hbm_to_vmem [thread:$0]  %s26_s16, 4096, %s28_s18, [#allocation6], %s240_s19, %s240_s19, %s241_s20  }
   0x8   :  { %232 = dma.done.wait [#allocation3], 256  }
   0x9   :  { %233 = vsyncadd [#allocation3], 4294967040 }
   0xa   :  { %234 = dma.done.wait [#allocation6], 4096  }
   0xb   :  { %235 = vsyncadd [#allocation6], 4294963200  ;;  %v91_v0 = vld [vmem:[#allocation5 + $0xf0] sm:$0xff]  ;;  %v92_v1 = vld [vmem:[#allocation5 + $0xf8] sm:$0xff]  ;;  %s242_s0 = smov [#allocation7]   ;;  %s142_s23 = sshll.u32 %s269_s2, 4  ;;  %s143_s23 = int_to_ptr.hbm [resolvable:$true] %s142_s23 }
   0xc   :  { %93 = vmatpush.xpose.msra.mxu0 %v91_v0  ;;  %113 = vmatpush.xpose.msra.mxu1 %v92_v1  ;;  %v89_v2 = vld [vmem:[#allocation5 + $0xe0] sm:$0xff]  ;;  %v90_v3 = vld [vmem:[#allocation5 + $0xe8] sm:$0xff]  ;;  %v87_v4 = vld [vmem:[#allocation5 + $0xd0] sm:$0xff]  ;;  %s140_s1 = sshll.u32 %s242_s0, 4  ;;  %s141_s1 = int_to_ptr.vmem [resolvable:$true] %s140_s1 }
   0xd   :  { %v88_v5 = vld [vmem:[#allocation5 + $0xd8] sm:$0xff]  ;;  %v42_v6 = vld [vmem:[#allocation2] sm:$0xff]  ;;  %v85_v10 = vld [vmem:[#allocation5 + $0xc0] sm:$0xff] }
   0xe   :  { %v43_v7 = vld [vmem:[#allocation2 + $0x8] sm:$0xff]  ;;  %v44_v8 = vmul.f32 %v42_v6, %v42_v6  ;;  %v86_v11 = vld [vmem:[#allocation5 + $0xc8] sm:$0xff]  ;;  %v83_v13 = vld [vmem:[#allocation5 + $0xb0] sm:$0xff] }
   0xf   :  { %v45_v9 = vmul.f32 %v43_v7, %v43_v7  ;;  %v84_v14 = vld [vmem:[#allocation5 + $0xb8] sm:$0xff]  ;;  %v81_v15 = vld [vmem:[#allocation5 + $0xa0] sm:$0xff]  ;;  %v82_v16 = vld [vmem:[#allocation5 + $0xa8] sm:$0xff] }
  0x10   :  { %94 = vmatpush.xpose.msra.mxu0 %v89_v2  ;;  %114 = vmatpush.xpose.msra.mxu1 %v90_v3  ;;  %v79_v17 = vld [vmem:[#allocation5 + $0x90] sm:$0xff]  ;;  %v80_v18 = vld [vmem:[#allocation5 + $0x98] sm:$0xff]  ;;  %v77_v19 = vld [vmem:[#allocation5 + $0x80] sm:$0xff] }
  0x11   :  { %v46_v12 = vadd.f32 %v45_v9, %v44_v8  ;;  %v78_v20 = vld [vmem:[#allocation5 + $0x88] sm:$0xff]  ;;  %v75_v21 = vld [vmem:[#allocation5 + $0x70] sm:$0xff]  ;;  %v76_v22 = vld [vmem:[#allocation5 + $0x78] sm:$0xff] }
  0x12   :  { %v73_v23 = vld [vmem:[#allocation5 + $0x60] sm:$0xff]  ;;  %v74_v24 = vld [vmem:[#allocation5 + $0x68] sm:$0xff]  ;;  %v71_v25 = vld [vmem:[#allocation5 + $0x50] sm:$0xff] }
  0x13   :  { %47 = vadd.xlane.f32.xlu0 %v46_v12  ;;  %v72_v26 = vld [vmem:[#allocation5 + $0x58] sm:$0xff]  ;;  %v69_v27 = vld [vmem:[#allocation5 + $0x40] sm:$0xff]  ;;  %v70_v28 = vld [vmem:[#allocation5 + $0x48] sm:$0xff] }
  0x14   :  { %95 = vmatpush.xpose.msra.mxu0 %v87_v4  ;;  %115 = vmatpush.xpose.msra.mxu1 %v88_v5  ;;  %v67_v29 = vld [vmem:[#allocation5 + $0x30] sm:$0xff]  ;;  %v68_v30 = vld [vmem:[#allocation5 + $0x38] sm:$0xff]  ;;  %v65_v31 = vld [vmem:[#allocation5 + $0x20] sm:$0xff] }
  0x15   :  { %v66_v32 = vld [vmem:[#allocation5 + $0x28] sm:$0xff]  ;;  %v63_v33 = vld [vmem:[#allocation5 + $0x10] sm:$0xff]  ;;  %v64_v34 = vld [vmem:[#allocation5 + $0x18] sm:$0xff] }
  0x16   :  { %v61_v35 = vld [vmem:[#allocation5] sm:$0xff]  ;;  %v62_v36 = vld [vmem:[#allocation5 + $0x8] sm:$0xff] }
  0x18   :  { %96 = vmatpush.xpose.msra.mxu0 %v85_v10  ;;  %116 = vmatpush.xpose.msra.mxu1 %v86_v11 }
  0x1c   :  { %97 = vmatpush.xpose.msra.mxu0 %v83_v13  ;;  %117 = vmatpush.xpose.msra.mxu1 %v84_v14 }
  0x20   :  { %98 = vmatpush.xpose.msra.mxu0 %v81_v15  ;;  %118 = vmatpush.xpose.msra.mxu1 %v82_v16 }
  0x24   :  { %99 = vmatpush.xpose.msra.mxu0 %v79_v17  ;;  %119 = vmatpush.xpose.msra.mxu1 %v80_v18 }
  0x28   :  { %100 = vmatpush.xpose.msra.mxu0 %v77_v19  ;;  %120 = vmatpush.xpose.msra.mxu1 %v78_v20 }
  0x2c   :  { %101 = vmatpush.xpose.msra.mxu0 %v75_v21  ;;  %121 = vmatpush.xpose.msra.mxu1 %v76_v22 }
  0x30   :  { %102 = vmatpush.xpose.msra.mxu0 %v73_v23  ;;  %122 = vmatpush.xpose.msra.mxu1 %v74_v24 }
  0x34   :  { %103 = vmatpush.xpose.msra.mxu0 %v71_v25  ;;  %123 = vmatpush.xpose.msra.mxu1 %v72_v26 }
  0x38   :  { %104 = vmatpush.xpose.msra.mxu0 %v69_v27  ;;  %124 = vmatpush.xpose.msra.mxu1 %v70_v28 }
  0x3c   :  { %105 = vmatpush.xpose.msra.mxu0 %v67_v29  ;;  %125 = vmatpush.xpose.msra.mxu1 %v68_v30 }
  0x40   :  { %106 = vmatpush.xpose.msra.mxu0 %v65_v31  ;;  %126 = vmatpush.xpose.msra.mxu1 %v66_v32 }
  0x44   :  { %107 = vmatpush.xpose.msra.mxu0 %v63_v33  ;;  %127 = vmatpush.xpose.msra.mxu1 %v64_v34 }
  0x48   :  { %108 = vmatpush.xpose.msra.mxu0 %v61_v35  ;;  %128 = vmatpush.xpose.msra.mxu1 %v62_v36 }
  0x4b   :  { %109 = vmatmul.f32.vlgmr.msra.gmra.mxu0 %v42_v6  ;;  %129 = vmatmul.f32.vlgmr.msra.gmra.mxu1 %v43_v7 }
  0x86   :  { %v48_v37 = vpop.xlane.xlu0 %47 }
  0x87   :  { %v49_v38 = vmax.f32 %v48_v37, 1e-24 }
  0x89   :  { %158 = vrsqrt.f32 %v49_v38  ;;  %vm56_vm0 = vweird.f32 %v49_v38 }
  0x8f   :  { %v159_v39 = vpop.eup %158 }
  0x90   :  { %v51_v40 = vmul.f32 %v159_v39, %v49_v38  ;;  %vm57_vm1 = vweird.f32 %v159_v39 }
  0x91   :  { %vm58_vm2 = vmor %vm56_vm0, %vm57_vm1 }
  0x92   :  { %v52_v41 = vmul.f32 %v159_v39, %v51_v40 }
  0x94   :  { %v53_v42 = vmul.f32 0.5, %v52_v41 }
  0x96   :  { %v54_v43 = vsub.f32 1.5, %v53_v42 }
  0x98   :  { %v55_v44 = vmul.f32 %v159_v39, %v54_v43 }
  0x9a   :  { %v59_v45 = vsel %vm58_vm2, %v159_v39, %v55_v44 }
  0x9b   :  { %v60_v48 = vmul.f32 20.0, %v59_v45 }
  0xc8   :  { %v110_v46 = vpop.f32.mrf.mxu0  ;;  %v130_v47 = vpop.f32.mrf.mxu1 }
  0xc9   :  { %v131_v49 = vadd.f32 %v130_v47, %v110_v46 }
  0xcb   :  { %v133_v50 = vmul.f32 %v131_v49, %v60_v48 }
  0xcd   :  { %134 = vst [vmem:[#allocation7] sm:$0xff] %v133_v50 }
  0xce   :  { %145 = dma.vmem_to_hbm [thread:$0]  %s141_s1, 128, %s143_s23, [#allocation4]  }
  0xcf   :  { %236 = dma.done.wait [#allocation4], 128  }
  0xd0   :  { %237 = vsyncadd [#allocation4], 4294967168 }
  0xd1   :  { %150 = vsyncpa [#allocation3], 1 }
  0xd2   :  { %151 = vsyncpa [#allocation6], 1 }
  0xd3   :  { %152 = vsyncpa [#allocation4], 1 }

</bundles_post_ra>
